<compile_context>
chip_gen: v5e
topology: v5e:2x2
jax: 0.10.0
libtpu: 0.0.40
codegen_flags: <defaults>
</compile_context>

<pallas_src>
import functools
import math

import jax
import jax.numpy as jnp
import numpy as np
from jax import lax
from jax.experimental import pallas as pl
from jax.experimental.pallas import tpu as pltpu


def mha_kernel(q_ref, k_ref, v_ref, wq_ref, wk_ref, wv_ref, wo_ref, bias_ref,
               out_ref, attn_ref, ctx_s, *, num_heads, d_k, mxu_dtype):
    nn_dims = (((1,), (0,)), ((), ()))  # (M,K) x (K,N) -> (M,N)
    nt_dims = (((1,), (1,)), ((), ()))  # (M,K) x (N,K) -> (M,N)
    scale = jnp.float32(1.0 / math.sqrt(d_k))

    # ---- full-width Q/K/V projections: (S, D) x (D, D) MXU matmuls, once.
    q_all = lax.dot_general(q_ref[0].astype(mxu_dtype),
                            wq_ref[...].astype(mxu_dtype), nn_dims,
                            preferred_element_type=jnp.float32)  # (Sq, D)
    k_all = lax.dot_general(k_ref[0].astype(mxu_dtype),
                            wk_ref[...].astype(mxu_dtype), nn_dims,
                            preferred_element_type=jnp.float32)  # (Sk, D)
    v_all = lax.dot_general(v_ref[0].astype(mxu_dtype),
                            wv_ref[...].astype(mxu_dtype), nn_dims,
                            preferred_element_type=jnp.float32)  # (Sk, D)
    # Fold 1/sqrt(d_k) into Q once instead of scaling every (Sq,Sk) block.
    q_all = q_all * scale

    bias = bias_ref[0, 0]  # (Sq, Sk) additive mask bias: 0 or -1e9

    # ---- per-head scaled dot-product attention (static unroll over heads).
    for hh in range(num_heads):
        lo = hh * d_k
        q_h = q_all[:, lo:lo + d_k]  # (Sq, d_k)
        k_h = k_all[:, lo:lo + d_k]  # (Sk, d_k)
        v_h = v_all[:, lo:lo + d_k]  # (Sk, d_k)

        sim = lax.dot_general(q_h.astype(mxu_dtype), k_h.astype(mxu_dtype),
                              nt_dims,
                              preferred_element_type=jnp.float32)  # (Sq, Sk)
        sim = sim + bias

        m = jnp.max(sim, axis=-1, keepdims=True)
        e = jnp.exp(sim - m)
        denom = jnp.sum(e, axis=-1, keepdims=True)
        w = e / denom  # exact softmax: returned weights sum to 1

        attn_ref[0, hh] = w

        # Write this head's context directly into its lane slice of the
        # (Sq, D) scratch -- no concat, lane-dense LHS for the Wo matmul.
        ctx_s[:, lo:lo + d_k] = lax.dot_general(
            w.astype(mxu_dtype), v_h.astype(mxu_dtype), nn_dims,
            preferred_element_type=jnp.float32)

    # ---- single full-width output projection.
    out_ref[0] = lax.dot_general(ctx_s[...].astype(mxu_dtype),
                                 wo_ref[...].astype(mxu_dtype), nn_dims,
                                 preferred_element_type=jnp.float32
                                 ).astype(out_ref.dtype)


def multi_head_attention(query, key, value, wq, wk, wv, wo, mask, *,
                         num_heads, mxu_dtype=jnp.bfloat16):
    """Forward pass of MultiHeadAttention (eval mode).

    Weights are in PyTorch nn.Linear convention [out, in]; mask follows the
    module convention (0 => masked out).
    """
    B, Sq, D = query.shape
    Sk = key.shape[1]
    d_k = D // num_heads
    assert D % num_heads == 0, "d_model must be divisible by num_heads"

    # Pre-transpose weights to [in, out] so all kernel matmuls are plain NN.
    wq_t = jnp.transpose(wq).astype(jnp.float32)
    wk_t = jnp.transpose(wk).astype(jnp.float32)
    wv_t = jnp.transpose(wv).astype(jnp.float32)
    wo_t = jnp.transpose(wo).astype(jnp.float32)

    # Additive mask bias (exactly reproduces masked_fill(mask==0, -1e9) after
    # softmax: masked logits underflow to weight 0 either way).
    bias = jnp.where(mask == 0, jnp.float32(-1000000000.0),
                     jnp.float32(0.0)).astype(jnp.float32)

    kernel = functools.partial(mha_kernel, num_heads=num_heads, d_k=d_k,
                               mxu_dtype=mxu_dtype)

    grid_spec = pltpu.PrefetchScalarGridSpec(
        num_scalar_prefetch=0,
        grid=(B,),
        in_specs=[
            pl.BlockSpec((1, Sq, D), lambda b: (b, 0, 0)),              # query
            pl.BlockSpec((1, Sk, D), lambda b: (b, 0, 0)),              # key
            pl.BlockSpec((1, Sk, D), lambda b: (b, 0, 0)),              # value
            pl.BlockSpec((D, D), lambda b: (0, 0)),                     # Wq^T
            pl.BlockSpec((D, D), lambda b: (0, 0)),                     # Wk^T
            pl.BlockSpec((D, D), lambda b: (0, 0)),                     # Wv^T
            pl.BlockSpec((D, D), lambda b: (0, 0)),                     # Wo^T
            pl.BlockSpec((1, 1, Sq, Sk), lambda b: (b, 0, 0, 0)),       # bias
        ],
        out_specs=[
            pl.BlockSpec((1, Sq, D), lambda b: (b, 0, 0)),              # out
            pl.BlockSpec((1, num_heads, Sq, Sk), lambda b: (b, 0, 0, 0)),
        ],
        scratch_shapes=[
            pltpu.VMEM((Sq, D), jnp.float32),   # per-batch concat'd context
        ],
    )

    out_shapes = (
        jax.ShapeDtypeStruct((B, Sq, D), jnp.float32),
        jax.ShapeDtypeStruct((B, num_heads, Sq, Sk), jnp.float32),
    )

    return pl.pallas_call(
        kernel,
        out_shape=out_shapes,
        grid_spec=grid_spec,
        compiler_params=pltpu.CompilerParams(
            dimension_semantics=("parallel",)),
    )(query, key, value, wq_t, wk_t, wv_t, wo_t, bias)


def reference_mha(query, key, value, wq, wk, wv, wo, mask, num_heads):
    """Pure-JAX reference mirroring the PyTorch forward (eval mode)."""
    B, Sq, D = query.shape
    Sk = key.shape[1]
    d_k = D // num_heads
    q = query @ wq.T
    k = key @ wk.T
    v = value @ wv.T
    q = q.reshape(B, Sq, num_heads, d_k).transpose(0, 2, 1, 3)
    k = k.reshape(B, Sk, num_heads, d_k).transpose(0, 2, 1, 3)
    v = v.reshape(B, Sk, num_heads, d_k).transpose(0, 2, 1, 3)
    sim = jnp.einsum("bhqd,bhkd->bhqk", q, k) / math.sqrt(d_k)
    sim = jnp.where(mask == 0, -1000000000.0, sim)
    w = jax.nn.softmax(sim, axis=-1)
    scores = jnp.einsum("bhqk,bhkd->bhqd", w, v)
    combined = scores.transpose(0, 2, 1, 3).reshape(B, Sq, D)
    return combined @ wo.T, w


if __name__ == "__main__":
    B, S, d_model, num_heads = 2, 8, 32, 4
    dropout = 0.1  # unused in eval mode

    key0 = jax.random.PRNGKey(0)
    kq, kk, kv, kwq, kwk, kwv, kwo = jax.random.split(key0, 7)

    query = jax.random.normal(kq, (B, S, d_model), dtype=jnp.float32)
    key_t = jax.random.normal(kk, (B, S, d_model), dtype=jnp.float32)
    value = jax.random.normal(kv, (B, S, d_model), dtype=jnp.float32)

    # Deterministic "learned" weights, PyTorch Linear convention [out, in].
    wq = jax.random.normal(kwq, (d_model, d_model), dtype=jnp.float32) * 0.05
    wk = jax.random.normal(kwk, (d_model, d_model), dtype=jnp.float32) * 0.05
    wv = jax.random.normal(kwv, (d_model, d_model), dtype=jnp.float32) * 0.05
    wo = jax.random.normal(kwo, (d_model, d_model), dtype=jnp.float32) * 0.05

    # Causal mask, [B, 1, Sq, Sk]; zeros are masked out (same as masked_fill).
    causal = jnp.tril(jnp.ones((S, S), dtype=jnp.float32))
    mask = jnp.broadcast_to(causal[None, None], (B, 1, S, S))

    out_ref_val, attn_ref_val = reference_mha(query, key_t, value, wq, wk, wv,
                                              wo, mask, num_heads)

    # --- default (bf16 MXU operands, f32 accumulation): fast path.
    out, attn = multi_head_attention(query, key_t, value, wq, wk, wv, wo, mask,
                                     num_heads=num_heads)
    out = jax.block_until_ready(out)
    attn = jax.block_until_ready(attn)
    np.testing.assert_allclose(np.asarray(out), np.asarray(out_ref_val),
                               rtol=3e-2, atol=3e-2)
    np.testing.assert_allclose(np.asarray(attn), np.asarray(attn_ref_val),
                               rtol=3e-2, atol=3e-2)

    # --- f32 MXU operands: matches the PyTorch module numerics closely.
    out32, attn32 = multi_head_attention(query, key_t, value, wq, wk, wv, wo,
                                         mask, num_heads=num_heads,
                                         mxu_dtype=jnp.float32)
    out32 = jax.block_until_ready(out32)
    attn32 = jax.block_until_ready(attn32)
    np.testing.assert_allclose(np.asarray(out32), np.asarray(out_ref_val),
                               rtol=2e-3, atol=2e-3)
    np.testing.assert_allclose(np.asarray(attn32), np.asarray(attn_ref_val),
                               rtol=2e-3, atol=2e-3)

    print("KERNEL_OK")
</pallas_src>

<mosaic_0001>
module attributes {stable_mosaic.version = 11 : i64} {
  func.func @mha_kernel(%arg0: i32, %arg1: memref<1x8x32xf32, #tpu.memory_space<vmem>>, %arg2: memref<1x8x32xf32, #tpu.memory_space<vmem>>, %arg3: memref<1x8x32xf32, #tpu.memory_space<vmem>>, %arg4: memref<32x32xf32, #tpu.memory_space<vmem>>, %arg5: memref<32x32xf32, #tpu.memory_space<vmem>>, %arg6: memref<32x32xf32, #tpu.memory_space<vmem>>, %arg7: memref<32x32xf32, #tpu.memory_space<vmem>>, %arg8: memref<1x1x8x8xf32, #tpu.memory_space<vmem>>, %arg9: memref<1x8x32xf32, #tpu.memory_space<vmem>>, %arg10: memref<1x4x8x8xf32, #tpu.memory_space<vmem>>, %arg11: memref<8x32xf32, #tpu.memory_space<vmem>>) attributes {dimension_semantics = [#tpu.dimension_semantics<parallel>], iteration_bounds = array<i64: 2>, scalar_prefetch = 0 : i64, scratch_operands = 1 : i64, tpu.core_type = #tpu.core_type<tc>, window_params = [{transform_indices = @transform_0, window_bounds = array<i64: 1, 8, 32>}, {transform_indices = @transform_1, window_bounds = array<i64: 1, 8, 32>}, {transform_indices = @transform_2, window_bounds = array<i64: 1, 8, 32>}, {pipeline_mode = #tpu.pipeline_mode<synchronous>, transform_indices = @transform_3, window_bounds = array<i64: 32, 32>}, {pipeline_mode = #tpu.pipeline_mode<synchronous>, transform_indices = @transform_4, window_bounds = array<i64: 32, 32>}, {pipeline_mode = #tpu.pipeline_mode<synchronous>, transform_indices = @transform_5, window_bounds = array<i64: 32, 32>}, {pipeline_mode = #tpu.pipeline_mode<synchronous>, transform_indices = @transform_6, window_bounds = array<i64: 32, 32>}, {transform_indices = @transform_7, window_bounds = array<i64: 1, 1, 8, 8>}, {transform_indices = @transform_8, window_bounds = array<i64: 1, 8, 32>}, {transform_indices = @transform_9, window_bounds = array<i64: 1, 4, 8, 8>}]} {
    %c0 = arith.constant 0 : index
    %c0_0 = arith.constant 0 : index
    %c0_1 = arith.constant 0 : index
    %0 = vector.load %arg1[%c0, %c0_0, %c0_1] : memref<1x8x32xf32, #tpu.memory_space<vmem>>, vector<1x8x32xf32>
    %1 = vector.shape_cast %0 : vector<1x8x32xf32> to vector<8x32xf32>
    %2 = arith.truncf %1 : vector<8x32xf32> to vector<8x32xbf16>
    %c0_2 = arith.constant 0 : index
    %c0_3 = arith.constant 0 : index
    %3 = vector.load %arg4[%c0_2, %c0_3] : memref<32x32xf32, #tpu.memory_space<vmem>>, vector<32x32xf32>
    %4 = arith.truncf %3 : vector<32x32xf32> to vector<32x32xbf16>
    %cst = arith.constant dense<0.000000e+00> : vector<8x32xf32>
    %5 = tpu.matmul %2, %4, %cst {dimension_numbers = #tpu.dot_dimension_numbers<[1], [0], [0], [1], [0, 0, 1, 1], [], []>} : vector<8x32xbf16>, vector<32x32xbf16>, vector<8x32xf32> -> vector<8x32xf32>
    %c0_4 = arith.constant 0 : index
    %c0_5 = arith.constant 0 : index
    %c0_6 = arith.constant 0 : index
    %6 = vector.load %arg2[%c0_4, %c0_5, %c0_6] : memref<1x8x32xf32, #tpu.memory_space<vmem>>, vector<1x8x32xf32>
    %7 = vector.shape_cast %6 : vector<1x8x32xf32> to vector<8x32xf32>
    %8 = arith.truncf %7 : vector<8x32xf32> to vector<8x32xbf16>
    %c0_7 = arith.constant 0 : index
    %c0_8 = arith.constant 0 : index
    %9 = vector.load %arg5[%c0_7, %c0_8] : memref<32x32xf32, #tpu.memory_space<vmem>>, vector<32x32xf32>
    %10 = arith.truncf %9 : vector<32x32xf32> to vector<32x32xbf16>
    %cst_9 = arith.constant dense<0.000000e+00> : vector<8x32xf32>
    %11 = tpu.matmul %8, %10, %cst_9 {dimension_numbers = #tpu.dot_dimension_numbers<[1], [0], [0], [1], [0, 0, 1, 1], [], []>} : vector<8x32xbf16>, vector<32x32xbf16>, vector<8x32xf32> -> vector<8x32xf32>
    %c0_10 = arith.constant 0 : index
    %c0_11 = arith.constant 0 : index
    %c0_12 = arith.constant 0 : index
    %12 = vector.load %arg3[%c0_10, %c0_11, %c0_12] : memref<1x8x32xf32, #tpu.memory_space<vmem>>, vector<1x8x32xf32>
    %13 = vector.shape_cast %12 : vector<1x8x32xf32> to vector<8x32xf32>
    %14 = arith.truncf %13 : vector<8x32xf32> to vector<8x32xbf16>
    %c0_13 = arith.constant 0 : index
    %c0_14 = arith.constant 0 : index
    %15 = vector.load %arg6[%c0_13, %c0_14] : memref<32x32xf32, #tpu.memory_space<vmem>>, vector<32x32xf32>
    %16 = arith.truncf %15 : vector<32x32xf32> to vector<32x32xbf16>
    %cst_15 = arith.constant dense<0.000000e+00> : vector<8x32xf32>
    %17 = tpu.matmul %14, %16, %cst_15 {dimension_numbers = #tpu.dot_dimension_numbers<[1], [0], [0], [1], [0, 0, 1, 1], [], []>} : vector<8x32xbf16>, vector<32x32xbf16>, vector<8x32xf32> -> vector<8x32xf32>
    %cst_16 = arith.constant 0.353553385 : f32
    %18 = vector.broadcast %cst_16 : f32 to vector<8x32xf32>
    %19 = arith.mulf %5, %18 : vector<8x32xf32>
    %c0_17 = arith.constant 0 : index
    %c0_18 = arith.constant 0 : index
    %c0_19 = arith.constant 0 : index
    %c0_20 = arith.constant 0 : index
    %20 = vector.load %arg8[%c0_17, %c0_18, %c0_19, %c0_20] : memref<1x1x8x8xf32, #tpu.memory_space<vmem>>, vector<1x1x8x8xf32>
    %21 = vector.shape_cast %20 : vector<1x1x8x8xf32> to vector<8x8xf32>
    %22 = vector.extract_strided_slice %19 {offsets = [0, 0], sizes = [8, 8], strides = [1, 1]} : vector<8x32xf32> to vector<8x8xf32>
    %23 = vector.extract_strided_slice %11 {offsets = [0, 0], sizes = [8, 8], strides = [1, 1]} : vector<8x32xf32> to vector<8x8xf32>
    %24 = vector.extract_strided_slice %17 {offsets = [0, 0], sizes = [8, 8], strides = [1, 1]} : vector<8x32xf32> to vector<8x8xf32>
    %25 = arith.truncf %22 : vector<8x8xf32> to vector<8x8xbf16>
    %26 = arith.truncf %23 : vector<8x8xf32> to vector<8x8xbf16>
    %cst_21 = arith.constant dense<0.000000e+00> : vector<8x8xf32>
    %27 = tpu.matmul %25, %26, %cst_21 {dimension_numbers = #tpu.dot_dimension_numbers<[1], [1], [0], [0], [0, 0, 1, 0], [], []>} : vector<8x8xbf16>, vector<8x8xbf16>, vector<8x8xf32> -> vector<8x8xf32>
    %28 = arith.addf %27, %21 : vector<8x8xf32>
    %cst_22 = arith.constant dense<0xFF800000> : vector<8xf32>
    %29 = vector.multi_reduction <maximumf>, %28, %cst_22 [1] : vector<8x8xf32> to vector<8xf32>
    %30 = vector.shape_cast %29 : vector<8xf32> to vector<8x1xf32>
    %31 = vector.broadcast %30 : vector<8x1xf32> to vector<8x8xf32>
    %32 = arith.subf %28, %31 : vector<8x8xf32>
    %33 = math.exp %32 : vector<8x8xf32>
    %cst_23 = arith.constant dense<0.000000e+00> : vector<8xf32>
    %34 = vector.multi_reduction <add>, %33, %cst_23 [1] : vector<8x8xf32> to vector<8xf32>
    %35 = vector.shape_cast %34 : vector<8xf32> to vector<8x1xf32>
    %36 = vector.broadcast %35 : vector<8x1xf32> to vector<8x8xf32>
    %37 = arith.divf %33, %36 : vector<8x8xf32>
    %c0_24 = arith.constant 0 : index
    %c0_25 = arith.constant 0 : index
    %c0_26 = arith.constant 0 : index
    %c0_27 = arith.constant 0 : index
    %38 = vector.load %arg10[%c0_24, %c0_25, %c0_26, %c0_27] : memref<1x4x8x8xf32, #tpu.memory_space<vmem>>, vector<1x1x8x8xf32>
    %39 = vector.shape_cast %38 : vector<1x1x8x8xf32> to vector<8x8xf32>
    %40 = vector.shape_cast %37 : vector<8x8xf32> to vector<1x1x8x8xf32>
    tpu.vector_store %arg10[%c0_24, %c0_25, %c0_26, %c0_27], %40 {strides = array<i32>} : memref<1x4x8x8xf32, #tpu.memory_space<vmem>>, vector<1x1x8x8xf32>,
    %41 = arith.truncf %37 : vector<8x8xf32> to vector<8x8xbf16>
    %42 = arith.truncf %24 : vector<8x8xf32> to vector<8x8xbf16>
    %cst_28 = arith.constant dense<0.000000e+00> : vector<8x8xf32>
    %43 = tpu.matmul %41, %42, %cst_28 {dimension_numbers = #tpu.dot_dimension_numbers<[1], [0], [0], [1], [0, 0, 1, 1], [], []>} : vector<8x8xbf16>, vector<8x8xbf16>, vector<8x8xf32> -> vector<8x8xf32>
    %c0_29 = arith.constant 0 : index
    %c0_30 = arith.constant 0 : index
    %44 = vector.load %arg11[%c0_29, %c0_30] : memref<8x32xf32, #tpu.memory_space<vmem>>, vector<8x8xf32>
    tpu.vector_store %arg11[%c0_29, %c0_30], %43 {strides = array<i32>} : memref<8x32xf32, #tpu.memory_space<vmem>>, vector<8x8xf32>,
    %45 = vector.extract_strided_slice %19 {offsets = [0, 8], sizes = [8, 8], strides = [1, 1]} : vector<8x32xf32> to vector<8x8xf32>
    %46 = vector.extract_strided_slice %11 {offsets = [0, 8], sizes = [8, 8], strides = [1, 1]} : vector<8x32xf32> to vector<8x8xf32>
    %47 = vector.extract_strided_slice %17 {offsets = [0, 8], sizes = [8, 8], strides = [1, 1]} : vector<8x32xf32> to vector<8x8xf32>
    %48 = arith.truncf %45 : vector<8x8xf32> to vector<8x8xbf16>
    %49 = arith.truncf %46 : vector<8x8xf32> to vector<8x8xbf16>
    %cst_31 = arith.constant dense<0.000000e+00> : vector<8x8xf32>
    %50 = tpu.matmul %48, %49, %cst_31 {dimension_numbers = #tpu.dot_dimension_numbers<[1], [1], [0], [0], [0, 0, 1, 0], [], []>} : vector<8x8xbf16>, vector<8x8xbf16>, vector<8x8xf32> -> vector<8x8xf32>
    %51 = arith.addf %50, %21 : vector<8x8xf32>
    %cst_32 = arith.constant dense<0xFF800000> : vector<8xf32>
    %52 = vector.multi_reduction <maximumf>, %51, %cst_32 [1] : vector<8x8xf32> to vector<8xf32>
    %53 = vector.shape_cast %52 : vector<8xf32> to vector<8x1xf32>
    %54 = vector.broadcast %53 : vector<8x1xf32> to vector<8x8xf32>
    %55 = arith.subf %51, %54 : vector<8x8xf32>
    %56 = math.exp %55 : vector<8x8xf32>
    %cst_33 = arith.constant dense<0.000000e+00> : vector<8xf32>
    %57 = vector.multi_reduction <add>, %56, %cst_33 [1] : vector<8x8xf32> to vector<8xf32>
    %58 = vector.shape_cast %57 : vector<8xf32> to vector<8x1xf32>
    %59 = vector.broadcast %58 : vector<8x1xf32> to vector<8x8xf32>
    %60 = arith.divf %56, %59 : vector<8x8xf32>
    %c0_34 = arith.constant 0 : index
    %c1 = arith.constant 1 : index
    %c0_35 = arith.constant 0 : index
    %c0_36 = arith.constant 0 : index
    %61 = vector.load %arg10[%c0_34, %c1, %c0_35, %c0_36] : memref<1x4x8x8xf32, #tpu.memory_space<vmem>>, vector<1x1x8x8xf32>
    %62 = vector.shape_cast %61 : vector<1x1x8x8xf32> to vector<8x8xf32>
    %63 = vector.shape_cast %60 : vector<8x8xf32> to vector<1x1x8x8xf32>
    tpu.vector_store %arg10[%c0_34, %c1, %c0_35, %c0_36], %63 {strides = array<i32>} : memref<1x4x8x8xf32, #tpu.memory_space<vmem>>, vector<1x1x8x8xf32>,
    %64 = arith.truncf %60 : vector<8x8xf32> to vector<8x8xbf16>
    %65 = arith.truncf %47 : vector<8x8xf32> to vector<8x8xbf16>
    %cst_37 = arith.constant dense<0.000000e+00> : vector<8x8xf32>
    %66 = tpu.matmul %64, %65, %cst_37 {dimension_numbers = #tpu.dot_dimension_numbers<[1], [0], [0], [1], [0, 0, 1, 1], [], []>} : vector<8x8xbf16>, vector<8x8xbf16>, vector<8x8xf32> -> vector<8x8xf32>
    %c0_38 = arith.constant 0 : index
    %c8 = arith.constant 8 : index
    %67 = vector.load %arg11[%c0_38, %c8] : memref<8x32xf32, #tpu.memory_space<vmem>>, vector<8x8xf32>
    tpu.vector_store %arg11[%c0_38, %c8], %66 {strides = array<i32>} : memref<8x32xf32, #tpu.memory_space<vmem>>, vector<8x8xf32>,
    %68 = vector.extract_strided_slice %19 {offsets = [0, 16], sizes = [8, 8], strides = [1, 1]} : vector<8x32xf32> to vector<8x8xf32>
    %69 = vector.extract_strided_slice %11 {offsets = [0, 16], sizes = [8, 8], strides = [1, 1]} : vector<8x32xf32> to vector<8x8xf32>
    %70 = vector.extract_strided_slice %17 {offsets = [0, 16], sizes = [8, 8], strides = [1, 1]} : vector<8x32xf32> to vector<8x8xf32>
    %71 = arith.truncf %68 : vector<8x8xf32> to vector<8x8xbf16>
    %72 = arith.truncf %69 : vector<8x8xf32> to vector<8x8xbf16>
    %cst_39 = arith.constant dense<0.000000e+00> : vector<8x8xf32>
    %73 = tpu.matmul %71, %72, %cst_39 {dimension_numbers = #tpu.dot_dimension_numbers<[1], [1], [0], [0], [0, 0, 1, 0], [], []>} : vector<8x8xbf16>, vector<8x8xbf16>, vector<8x8xf32> -> vector<8x8xf32>
    %74 = arith.addf %73, %21 : vector<8x8xf32>
    %cst_40 = arith.constant dense<0xFF800000> : vector<8xf32>
    %75 = vector.multi_reduction <maximumf>, %74, %cst_40 [1] : vector<8x8xf32> to vector<8xf32>
    %76 = vector.shape_cast %75 : vector<8xf32> to vector<8x1xf32>
    %77 = vector.broadcast %76 : vector<8x1xf32> to vector<8x8xf32>
    %78 = arith.subf %74, %77 : vector<8x8xf32>
    %79 = math.exp %78 : vector<8x8xf32>
    %cst_41 = arith.constant dense<0.000000e+00> : vector<8xf32>
    %80 = vector.multi_reduction <add>, %79, %cst_41 [1] : vector<8x8xf32> to vector<8xf32>
    %81 = vector.shape_cast %80 : vector<8xf32> to vector<8x1xf32>
    %82 = vector.broadcast %81 : vector<8x1xf32> to vector<8x8xf32>
    %83 = arith.divf %79, %82 : vector<8x8xf32>
    %c0_42 = arith.constant 0 : index
    %c2 = arith.constant 2 : index
    %c0_43 = arith.constant 0 : index
    %c0_44 = arith.constant 0 : index
    %84 = vector.load %arg10[%c0_42, %c2, %c0_43, %c0_44] : memref<1x4x8x8xf32, #tpu.memory_space<vmem>>, vector<1x1x8x8xf32>
    %85 = vector.shape_cast %84 : vector<1x1x8x8xf32> to vector<8x8xf32>
    %86 = vector.shape_cast %83 : vector<8x8xf32> to vector<1x1x8x8xf32>
    tpu.vector_store %arg10[%c0_42, %c2, %c0_43, %c0_44], %86 {strides = array<i32>} : memref<1x4x8x8xf32, #tpu.memory_space<vmem>>, vector<1x1x8x8xf32>,
    %87 = arith.truncf %83 : vector<8x8xf32> to vector<8x8xbf16>
    %88 = arith.truncf %70 : vector<8x8xf32> to vector<8x8xbf16>
    %cst_45 = arith.constant dense<0.000000e+00> : vector<8x8xf32>
    %89 = tpu.matmul %87, %88, %cst_45 {dimension_numbers = #tpu.dot_dimension_numbers<[1], [0], [0], [1], [0, 0, 1, 1], [], []>} : vector<8x8xbf16>, vector<8x8xbf16>, vector<8x8xf32> -> vector<8x8xf32>
    %c0_46 = arith.constant 0 : index
    %c16 = arith.constant 16 : index
    %90 = vector.load %arg11[%c0_46, %c16] : memref<8x32xf32, #tpu.memory_space<vmem>>, vector<8x8xf32>
    tpu.vector_store %arg11[%c0_46, %c16], %89 {strides = array<i32>} : memref<8x32xf32, #tpu.memory_space<vmem>>, vector<8x8xf32>,
    %91 = vector.extract_strided_slice %19 {offsets = [0, 24], sizes = [8, 8], strides = [1, 1]} : vector<8x32xf32> to vector<8x8xf32>
    %92 = vector.extract_strided_slice %11 {offsets = [0, 24], sizes = [8, 8], strides = [1, 1]} : vector<8x32xf32> to vector<8x8xf32>
    %93 = vector.extract_strided_slice %17 {offsets = [0, 24], sizes = [8, 8], strides = [1, 1]} : vector<8x32xf32> to vector<8x8xf32>
    %94 = arith.truncf %91 : vector<8x8xf32> to vector<8x8xbf16>
    %95 = arith.truncf %92 : vector<8x8xf32> to vector<8x8xbf16>
    %cst_47 = arith.constant dense<0.000000e+00> : vector<8x8xf32>
    %96 = tpu.matmul %94, %95, %cst_47 {dimension_numbers = #tpu.dot_dimension_numbers<[1], [1], [0], [0], [0, 0, 1, 0], [], []>} : vector<8x8xbf16>, vector<8x8xbf16>, vector<8x8xf32> -> vector<8x8xf32>
    %97 = arith.addf %96, %21 : vector<8x8xf32>
    %cst_48 = arith.constant dense<0xFF800000> : vector<8xf32>
    %98 = vector.multi_reduction <maximumf>, %97, %cst_48 [1] : vector<8x8xf32> to vector<8xf32>
    %99 = vector.shape_cast %98 : vector<8xf32> to vector<8x1xf32>
    %100 = vector.broadcast %99 : vector<8x1xf32> to vector<8x8xf32>
    %101 = arith.subf %97, %100 : vector<8x8xf32>
    %102 = math.exp %101 : vector<8x8xf32>
    %cst_49 = arith.constant dense<0.000000e+00> : vector<8xf32>
    %103 = vector.multi_reduction <add>, %102, %cst_49 [1] : vector<8x8xf32> to vector<8xf32>
    %104 = vector.shape_cast %103 : vector<8xf32> to vector<8x1xf32>
    %105 = vector.broadcast %104 : vector<8x1xf32> to vector<8x8xf32>
    %106 = arith.divf %102, %105 : vector<8x8xf32>
    %c0_50 = arith.constant 0 : index
    %c3 = arith.constant 3 : index
    %c0_51 = arith.constant 0 : index
    %c0_52 = arith.constant 0 : index
    %107 = vector.load %arg10[%c0_50, %c3, %c0_51, %c0_52] : memref<1x4x8x8xf32, #tpu.memory_space<vmem>>, vector<1x1x8x8xf32>
    %108 = vector.shape_cast %107 : vector<1x1x8x8xf32> to vector<8x8xf32>
    %109 = vector.shape_cast %106 : vector<8x8xf32> to vector<1x1x8x8xf32>
    tpu.vector_store %arg10[%c0_50, %c3, %c0_51, %c0_52], %109 {strides = array<i32>} : memref<1x4x8x8xf32, #tpu.memory_space<vmem>>, vector<1x1x8x8xf32>,
    %110 = arith.truncf %106 : vector<8x8xf32> to vector<8x8xbf16>
    %111 = arith.truncf %93 : vector<8x8xf32> to vector<8x8xbf16>
    %cst_53 = arith.constant dense<0.000000e+00> : vector<8x8xf32>
    %112 = tpu.matmul %110, %111, %cst_53 {dimension_numbers = #tpu.dot_dimension_numbers<[1], [0], [0], [1], [0, 0, 1, 1], [], []>} : vector<8x8xbf16>, vector<8x8xbf16>, vector<8x8xf32> -> vector<8x8xf32>
    %c0_54 = arith.constant 0 : index
    %c24 = arith.constant 24 : index
    %113 = vector.load %arg11[%c0_54, %c24] : memref<8x32xf32, #tpu.memory_space<vmem>>, vector<8x8xf32>
    tpu.vector_store %arg11[%c0_54, %c24], %112 {strides = array<i32>} : memref<8x32xf32, #tpu.memory_space<vmem>>, vector<8x8xf32>,
    %c0_55 = arith.constant 0 : index
    %c0_56 = arith.constant 0 : index
    %114 = vector.load %arg11[%c0_55, %c0_56] : memref<8x32xf32, #tpu.memory_space<vmem>>, vector<8x32xf32>
    %115 = arith.truncf %114 : vector<8x32xf32> to vector<8x32xbf16>
    %c0_57 = arith.constant 0 : index
    %c0_58 = arith.constant 0 : index
    %116 = vector.load %arg7[%c0_57, %c0_58] : memref<32x32xf32, #tpu.memory_space<vmem>>, vector<32x32xf32>
    %117 = arith.truncf %116 : vector<32x32xf32> to vector<32x32xbf16>
    %cst_59 = arith.constant dense<0.000000e+00> : vector<8x32xf32>
    %118 = tpu.matmul %115, %117, %cst_59 {dimension_numbers = #tpu.dot_dimension_numbers<[1], [0], [0], [1], [0, 0, 1, 1], [], []>} : vector<8x32xbf16>, vector<32x32xbf16>, vector<8x32xf32> -> vector<8x32xf32>
    %c0_60 = arith.constant 0 : index
    %c0_61 = arith.constant 0 : index
    %c0_62 = arith.constant 0 : index
    %119 = vector.load %arg9[%c0_60, %c0_61, %c0_62] : memref<1x8x32xf32, #tpu.memory_space<vmem>>, vector<1x8x32xf32>
    %120 = vector.shape_cast %119 : vector<1x8x32xf32> to vector<8x32xf32>
    %121 = vector.shape_cast %118 : vector<8x32xf32> to vector<1x8x32xf32>
    tpu.vector_store %arg9[%c0_60, %c0_61, %c0_62], %121 {strides = array<i32>} : memref<1x8x32xf32, #tpu.memory_space<vmem>>, vector<1x8x32xf32>,
    return
  }
  func.func @transform_0(%arg0: i32) -> (i32, i32, i32) {
    %c0_i32 = arith.constant 0 : i32
    %c0_i32_0 = arith.constant 0 : i32
    %c0_i32_1 = arith.constant 0 : i32
    return %arg0, %c0_i32, %c0_i32_0 : i32, i32, i32
  }
  func.func @transform_1(%arg0: i32) -> (i32, i32, i32) {
    %c0_i32 = arith.constant 0 : i32
    %c0_i32_0 = arith.constant 0 : i32
    %c0_i32_1 = arith.constant 0 : i32
    return %arg0, %c0_i32, %c0_i32_0 : i32, i32, i32
  }
  func.func @transform_2(%arg0: i32) -> (i32, i32, i32) {
    %c0_i32 = arith.constant 0 : i32
    %c0_i32_0 = arith.constant 0 : i32
    %c0_i32_1 = arith.constant 0 : i32
    return %arg0, %c0_i32, %c0_i32_0 : i32, i32, i32
  }
  func.func @transform_3(%arg0: i32) -> (i32, i32) {
    %c0_i32 = arith.constant 0 : i32
    %c0_i32_0 = arith.constant 0 : i32
    %c0_i32_1 = arith.constant 0 : i32
    return %c0_i32, %c0_i32_0 : i32, i32
  }
  func.func @transform_4(%arg0: i32) -> (i32, i32) {
    %c0_i32 = arith.constant 0 : i32
    %c0_i32_0 = arith.constant 0 : i32
    %c0_i32_1 = arith.constant 0 : i32
    return %c0_i32, %c0_i32_0 : i32, i32
  }
  func.func @transform_5(%arg0: i32) -> (i32, i32) {
    %c0_i32 = arith.constant 0 : i32
    %c0_i32_0 = arith.constant 0 : i32
    %c0_i32_1 = arith.constant 0 : i32
    return %c0_i32, %c0_i32_0 : i32, i32
  }
  func.func @transform_6(%arg0: i32) -> (i32, i32) {
    %c0_i32 = arith.constant 0 : i32
    %c0_i32_0 = arith.constant 0 : i32
    %c0_i32_1 = arith.constant 0 : i32
    return %c0_i32, %c0_i32_0 : i32, i32
  }
  func.func @transform_7(%arg0: i32) -> (i32, i32, i32, i32) {
    %c0_i32 = arith.constant 0 : i32
    %c0_i32_0 = arith.constant 0 : i32
    %c0_i32_1 = arith.constant 0 : i32
    %c0_i32_2 = arith.constant 0 : i32
    return %arg0, %c0_i32, %c0_i32_0, %c0_i32_1 : i32, i32, i32, i32
  }
  func.func @transform_8(%arg0: i32) -> (i32, i32, i32) {
    %c0_i32 = arith.constant 0 : i32
    %c0_i32_0 = arith.constant 0 : i32
    %c0_i32_1 = arith.constant 0 : i32
    return %arg0, %c0_i32, %c0_i32_0 : i32, i32, i32
  }
  func.func @transform_9(%arg0: i32) -> (i32, i32, i32, i32) {
    %c0_i32 = arith.constant 0 : i32
    %c0_i32_0 = arith.constant 0 : i32
    %c0_i32_1 = arith.constant 0 : i32
    %c0_i32_2 = arith.constant 0 : i32
    return %arg0, %c0_i32, %c0_i32_0, %c0_i32_1 : i32, i32, i32, i32
  }
}

</mosaic_0001>

<bundles_post_ra>
// kernel: tpu_custom_call.1
= control target key start
LH: loop header
LB: loop body
LE: loop exit
PB: predicated region body
PF: predicated region fallthrough
CT: control target
= control target key end

     0   :  { %s2130_s0 = inlined_call_operand.hbm [shape: f32[2,8,32], index: 0, kind: input, shape index: {}]   ;;  %s2131_s1 = inlined_call_operand.hbm [shape: f32[2,8,32], index: 1, kind: input, shape index: {}]   ;;  %s2132_s2 = inlined_call_operand.hbm [shape: f32[2,8,32], index: 2, kind: input, shape index: {}]   ;;  %s2133_s3 = inlined_call_operand.hbm [shape: f32[32,32], index: 3, kind: input, shape index: {}]   ;;  %s2134_s4 = inlined_call_operand.hbm [shape: f32[32,32], index: 4, kind: input, shape index: {}]   ;;  %s2135_s5 = inlined_call_operand.hbm [shape: f32[32,32], index: 5, kind: input, shape index: {}]   ;;  %s2136_s6 = inlined_call_operand.hbm [shape: f32[32,32], index: 6, kind: input, shape index: {}]   ;;  %s2137_s7 = inlined_call_operand.hbm [shape: f32[2,1,8,8], index: 7, kind: input, shape index: {}]   ;;  %s2138_s8 = inlined_call_operand.hbm [shape: f32[2,8,32], index: 8, kind: output, shape index: {0}]   ;;  %s2139_s9 = inlined_call_operand.hbm [shape: f32[2,4,8,8], index: 9, kind: output, shape index: {1}]  }
   0x1   :  { %2150 = sst [smem:[#allocation32_spill]] %s2131_s1 }
   0x2   :  { %2151 = sst [smem:[#allocation33_spill]] %s2133_s3 }
   0x3   :  { %2152 = sst [smem:[#allocation34_spill]] %s2134_s4 }
   0x4   :  { %2153 = sst [smem:[#allocation35_spill]] %s2135_s5 }
   0x5   :  { %2154 = sst [smem:[#allocation36_spill]] %s2136_s6 }
   0x6   :  { %15 = vsyncpa [#allocation4], 0 }
   0x7   :  { %17 = vsyncpa [#allocation4 + $0x1], 0 }
   0x8   :  { %18 = vsyncpa [#allocation7], 0 }
   0x9   :  { %20 = vsyncpa [#allocation7 + $0x1], 0 }
   0xa   :  { %21 = vsyncpa [#allocation10], 0 }
   0xb   :  { %22 = vsyncpa [#allocation13], 0 }
   0xc   :  { %23 = vsyncpa [#allocation16], 0 }
   0xd   :  { %25 = vsyncpa [#allocation16 + $0x1], 0 }
   0xe   :  { %26 = vsyncpa [#allocation5], 0 }
   0xf   :  { %28 = vsyncpa [#allocation5 + $0x1], 0 }
  0x10   :  { %29 = vsyncpa [#allocation19], 0 }
  0x11   :  { %31 = vsyncpa [#allocation19 + $0x1], 0  ;;  %s1791_s30 = smov 0   ;;  %s1793_s10 = smov 0  }
  0x12   :  { %s1795_s11 = smov 0   ;;  %s1797_s12 = smov 0  }
  0x13 LB: > { %2155 = sst [smem:[#allocation27_spill]] %s1722_s11  ;;  %s1812_s13 = sadd.s32 4294967295, %s1726_s12   ;;  %s1726_s12 = sphi %s1797_s12, %s2180_s12   ;;  %s1722_s11 = sphi %s1795_s11, %s2182_s11   ;;  %s1718_s10 = sphi %s1793_s10, %s2184_s10   ;;  %s1714_s30 = sphi %s1791_s30, %s2183_s30  }
  0x14   : > { %2156 = sst [smem:[#allocation28_spill]] %s1726_s12  ;;  %s1191_s14 = sadd.s32 4294967294, %s1726_s12  }
  0x15   : > { %p57_p0 = scmp.ne.s32.totalorder %s1718_s10, %s1714_s30  ;;  %p2148_p1 = scmp.eq.s32.totalorder %s1812_s13, 0 }
  0x16   : > { %p243_p2 = scmp.eq.s32.totalorder %s1812_s13, 1  ;;  %p249_p3 = scmp.eq.s32.totalorder %s1191_s14, 1 }
  0x17   : > { %p1821_p4 = por %p2148_p1, %p57_p0  ;;  %p1192_p5 = scmp.ge.s32.totalorder %s1726_s12, 1 }
  0x18   : > { %p1826_p6 = por %p249_p3, %p57_p0  ;;  %p282_p7 = scmp.lt.s32.totalorder %s1726_s12, 3 }
  0x19   : > { %s2160_s3 = sld [smem:[#allocation33_spill]]  ;;  %s1728_s21 = smov [#allocation9]  }
  0x1a   : > { %s2158_s16 = scalar_select %p1826_p6, 1, 0 }
  0x1b   : > { %p1834_p8 = pnand %p1192_p5, %p282_p7  ;;  %s295_s22 = sshll.u32 %s1728_s21, 4  ;;  %s296_s22 = int_to_ptr.vmem [resolvable:$true] %s295_s22 }
  0x1c   : > { %2159 = sst [smem:[#allocation29_spill]] %s2158_s16  ;;  %s2140_s27 = smov 128  }
  0x1d   : > { %p1268_p9 = pneg %p1834_p8  ;;  %s2163_s5 = sld [smem:[#allocation35_spill]] }
  0x1e   : > { %s2142_s28 = smov 8   ;;  %s1731_s29 = smov [#allocation12]  }
  0x1f   : > { %s293_s19 = sshll.u32 %s2160_s3, 4  ;;  %p1842_p10 = pnand %p1268_p9, %p2148_p1  ;;  %s294_s19 = int_to_ptr.hbm [resolvable:$true] %s293_s19 }
  0x20   : > { %s323_s14 = sshll.u32 %s1731_s29, 4  ;;  %s1861_s17 = sadd.s32 1, %s1726_s12   ;;  %s324_s14 = int_to_ptr.vmem [resolvable:$true] %s323_s14 }
  0x21   : > { %1271 = dma.hbm_to_vmem [thread:$0]  (!%p1842_p10), %s294_s19, 512, %s296_s22, [#allocation10], %s2140_s27, %s2140_s27, %s2142_s28  }
  0x22   : > { %2164 = sst [smem:[#allocation30_spill]] %s1861_s17  ;;  %s44_s18 = sadd.s32 1, %s1722_s11 }
  0x23   : > { %s321_s26 = sshll.u32 %s2163_s5, 4  ;;  %s41_s21 = ssub.s32 %s1726_s12, %s1861_s17  ;;  %s322_s26 = int_to_ptr.hbm [resolvable:$true] %s321_s26 }
  0x24   : > { %1277 = dma.hbm_to_vmem [thread:$0]  (!%p1842_p10), %s322_s26, 512, %s324_s14, [#allocation13], %s2140_s27, %s2140_s27, %s2142_s28  }
  0x25   : > { %p51_p12 = scmp.ne.s32.totalorder %s1722_s11, %s1718_s10  ;;  %p42_p13 = scmp.eq.s32.totalorder %s41_s21, 0 }
  0x26   : > { %p52_p0 = scmp.eq.s32.totalorder %s1726_s12, 0  ;;  %p1305_p5 = scmp.lt.s32.totalorder %s1726_s12, 2 }
  0x27   : > { %p1871_p3 = por %p243_p2, %p51_p12  ;;  %s1880_s24 = sand.u32 1, %s1722_s11  }
  0x28   : > { %s1877_s22 = scalar_select %p42_p13, %s1722_s11, %s44_s18  }
  0x29   : > { %p53_p7 = por %p52_p0, %p51_p12  ;;  %s1883_s25 = sshll.u32 %s1880_s24, 3 }
  0x2a   : > { %2166 = sst [smem:[#allocation31_spill]] %s1877_s22  ;;  %s1886_s26 = sshll.u32 %s1726_s12, 3 }
  0x2b   : > { %p1888_p9 = pnand %p1305_p5, %p53_p7  ;;  %s370_s14 = sand.u32 1, %s1726_s12  }
  0x2c   : > { %s2168_s1 = sld [smem:[#allocation32_spill]]  ;;  %s374_s3 = scalar_lea.vmem [#allocation6], %s1883_s25 }
  0x2d   : > { %s382_s5 = sshll.u32 %s374_s3, 4  ;;  %s1898_s22 = scalar_lea.sflag [#allocation7], %s370_s14  ;;  %s383_s5 = int_to_ptr.vmem [resolvable:$true] %s382_s5 }
  0x2e   : > { %p1436_p12 = pneg %p1888_p9 }
  0x32   : > { %s378_s27 = scalar_lea.hbm %s2168_s1, %s1886_s26 }
  0x33   : > { %s380_s28 = sshll.u32 %s378_s27, 4  ;;  %s1439_s27 = scalar_lea.hbm %s2168_s1, 16  ;;  %s381_s28 = int_to_ptr.hbm [resolvable:$true] %s380_s28 }
  0x34   : > { %s1432_s11 = sshra.s32 %s381_s28, 4  ;;  %s1433_s11 = int_to_ptr.hbm [resolvable:$true] %s1432_s11 }
  0x35   : > { %s1434_s17 = scalar_lea.hbm %s1433_s11, 8  ;;  %p1440_p5 = scmp.lt.s32.totalorder %s1433_s11, %s2168_s1 }
  0x36   : > { %p1435_p2 = scmp.ne.s32.totalorder %s1433_s11, %s1434_s17  ;;  %p1441_p7 = scmp.lt.s32.totalorder %s1439_s27, %s1434_s17 }
  0x38   : > { %p1437_p13 = pnand %p1436_p12, %p1435_p2  ;;  %p1442_p11 = por %p1441_p7, %p1440_p5 }
  0x3a   : > { %p1438_p0 = pneg %p1437_p13 }
  0x3c   : > { %p1443_p1 = pnand %p1442_p11, %p1438_p0 }
  0x3e   : > { %1446 = shalt.err (!%p1443_p1)
}
  0x3f   : > { %1287 = dma.hbm_to_vmem [thread:$0]  (!%p1888_p9), %s381_s28, 128, %s383_s5, %s1898_s22  }
  0x40   : > { %s2169_s4 = sld [smem:[#allocation34_spill]]  ;;  %s1732_s21 = smov [#allocation11]  }
  0x41   : > { %s309_s11 = sshll.u32 %s1732_s21, 4  ;;  %s2170_s6 = sld [smem:[#allocation36_spill]]  ;;  %s310_s11 = int_to_ptr.vmem [resolvable:$true] %s309_s11 }
  0x42   : > { %s2171_s3 = smov 8   ;;  %s2172_s1 = smov 128  }
  0x43   : > { %s1733_s5 = smov [#allocation14]   ;;  %s359_s21 = scalar_lea.hbm %s2130_s0, %s1886_s26 }
  0x44   : > { %s337_s28 = sshll.u32 %s1733_s5, 4  ;;  %s355_s17 = scalar_lea.vmem [#allocation3], %s1883_s25  ;;  %s338_s28 = int_to_ptr.vmem [resolvable:$true] %s337_s28 }
  0x45   : > { %s363_s27 = sshll.u32 %s355_s17, 4  ;;  %s364_s27 = int_to_ptr.vmem [resolvable:$true] %s363_s27 }
  0x46   : > { %s307_s12 = sshll.u32 %s2169_s4, 4  ;;  %s361_s4 = sshll.u32 %s359_s21, 4  ;;  %s308_s12 = int_to_ptr.hbm [resolvable:$true] %s307_s12  ;;  %s362_s4 = int_to_ptr.hbm [resolvable:$true] %s361_s4 }
  0x47   : > { %s335_s18 = sshll.u32 %s2170_s6, 4  ;;  %s336_s18 = int_to_ptr.hbm [resolvable:$true] %s335_s18 }
  0x48   : > { %1274 = dma.hbm_to_vmem [thread:$0]  (!%p1842_p10), %s308_s12, 512, %s310_s11, [#allocation10], %s2172_s1, %s2172_s1, %s2171_s3  }
  0x49   : > { %1280 = dma.hbm_to_vmem [thread:$0]  (!%p1842_p10), %s336_s18, 512, %s338_s28, [#allocation13], %s2172_s1, %s2172_s1, %s2171_s3  }
  0x4a   : > { %s352_s12 = scalar_lea.sflag [#allocation4], %s1880_s24  ;;  %s1522_s11 = sshra.s32 %s362_s4, 4  ;;  %s1523_s11 = int_to_ptr.hbm [resolvable:$true] %s1522_s11 }
  0x4b   : > { %s1524_s6 = scalar_lea.hbm %s1523_s11, 8  ;;  %s1529_s18 = scalar_lea.hbm %s2130_s0, 16 }
  0x4c   : > { %p1525_p1 = scmp.ne.s32.totalorder %s1523_s11, %s1524_s6  ;;  %p1530_p10 = scmp.lt.s32.totalorder %s1523_s11, %s2130_s0 }
  0x4d   : > { %p1531_p13 = scmp.lt.s32.totalorder %s1529_s18, %s1524_s6 }
  0x4e   : > { %p1527_p11 = pnand %p1525_p1, %p1436_p12 }
  0x4f   : > { %p1532_p0 = por %p1531_p13, %p1530_p10 }
  0x50   : > { %p1528_p2 = pneg %p1527_p11 }
  0x52   : > { %p1533_p5 = pnand %p1532_p0, %p1528_p2 }
  0x54   : > { %1536 = shalt.err (!%p1533_p5)
}
  0x55   : > { %1284 = dma.hbm_to_vmem [thread:$0]  (!%p1888_p9), %s362_s4, 128, %s364_s27, %s352_s12  }
  0x56   : > { %s397_s14 = scalar_lea.hbm %s2132_s2, %s1886_s26  ;;  %s393_s21 = scalar_lea.vmem [#allocation8], %s1883_s25 }
  0x57   : > { %s401_s17 = sshll.u32 %s393_s21, 4  ;;  %s399_s23 = sshll.u32 %s397_s14, 4  ;;  %s402_s17 = int_to_ptr.vmem [resolvable:$true] %s401_s17  ;;  %s400_s23 = int_to_ptr.hbm [resolvable:$true] %s399_s23 }
  0x58   : > { %s1552_s11 = sshra.s32 %s400_s23, 4  ;;  %s1559_s4 = scalar_lea.hbm %s2132_s2, 16  ;;  %s1553_s11 = int_to_ptr.hbm [resolvable:$true] %s1552_s11 }
  0x59   : > { %s1554_s6 = scalar_lea.hbm %s1553_s11, 8  ;;  %p1560_p2 = scmp.lt.s32.totalorder %s1553_s11, %s2132_s2 }
  0x5a   : > { %p1555_p7 = scmp.ne.s32.totalorder %s1553_s11, %s1554_s6  ;;  %p1561_p10 = scmp.lt.s32.totalorder %s1559_s4, %s1554_s6 }
  0x5c   : > { %p1557_p1 = pnand %p1555_p7, %p1436_p12  ;;  %p1562_p13 = por %p1561_p10, %p1560_p2 }
  0x5e   : > { %p1558_p11 = pneg %p1557_p1 }
  0x60   : > { %p1563_p0 = pnand %p1562_p13, %p1558_p11 }
  0x62   : > { %1566 = shalt.err (!%p1563_p0)
}
  0x63   : > { %1290 = dma.hbm_to_vmem [thread:$0]  (!%p1888_p9), %s400_s23, 128, %s402_s17, %s1898_s22  }
  0x64   : > { %s416_s28 = scalar_lea.hbm %s2137_s7, %s1886_s26  ;;  %s412_s14 = scalar_lea.vmem [#allocation15], %s1883_s25 }
  0x65   : > { %s418_s16 = sshll.u32 %s416_s28, 4  ;;  %s420_s21 = sshll.u32 %s412_s14, 4  ;;  %s419_s16 = int_to_ptr.hbm [resolvable:$true] %s418_s16  ;;  %s421_s21 = int_to_ptr.vmem [resolvable:$true] %s420_s21 }
  0x66   : > { %s409_s11 = scalar_lea.sflag [#allocation16], %s1880_s24  ;;  %s1582_s6 = sshra.s32 %s419_s16, 4  ;;  %s1583_s6 = int_to_ptr.hbm [resolvable:$true] %s1582_s6 }
  0x67   : > { %s1584_s1 = scalar_lea.hbm %s1583_s6, 8  ;;  %s1589_s17 = scalar_lea.hbm %s2137_s7, 16 }
  0x68   : > { %p1585_p5 = scmp.ne.s32.totalorder %s1583_s6, %s1584_s1  ;;  %p1590_p11 = scmp.lt.s32.totalorder %s1583_s6, %s2137_s7 }
  0x69   : > { %p1591_p2 = scmp.lt.s32.totalorder %s1589_s17, %s1584_s1 }
  0x6a   : > { %p1587_p7 = pnand %p1585_p5, %p1436_p12 }
  0x6b   : > { %p1592_p10 = por %p1591_p2, %p1590_p11 }
  0x6c   : > { %p1588_p1 = pneg %p1587_p7 }
  0x6e   : > { %p1593_p13 = pnand %p1592_p10, %p1588_p1 }
  0x70   : > { %1596 = shalt.err (!%p1593_p13)
}
  0x71   : > { %1293 = dma.hbm_to_vmem [thread:$0]  (!%p1888_p9), %s419_s16, 128, %s421_s21, %s409_s11  }
  0x72   : > { %429 = sbr.rel (%p1834_p8) target bundleno = 1211 (0x4bb), region = 52  ;;  %s1984_s24 = sand.u32 (!%p1834_p8), 1, %s1718_s10  }
  0x73   : > { %s1987_s25 = sshll.u32 (!%p1834_p8), %s1984_s24, 3  ;;  %s432_s4 = scalar_lea.sflag (!%p1834_p8), [#allocation4], %s1984_s24 }
  0x74   : > { %s435_s27 = scalar_lea.vmem (!%p1834_p8), [#allocation3], %s1987_s25 }
  0x77   : > { %1685 = dma.done.wait (%p1821_p4), %s432_s4, 128  }
  0x78   : > { %1687 = vsyncadd (%p1821_p4), %s432_s4, 4294967168  ;;  %s441_s20 = sand.u32 1, %s1812_s13   ;;  %s445_s12 = scalar_lea.vmem [#allocation6], %s1987_s25 }
  0x79   : > { %s442_s29 = scalar_lea.sflag [#allocation7], %s441_s20 }
  0x7a   : > { %1689 = dma.done.wait (%p1821_p4), %s442_s29, 256  }
  0x7b   : > { %1691 = vsyncadd (%p1821_p4), %s442_s29, 4294967040  ;;  %s455_s3 = scalar_lea.vmem [#allocation8], %s1987_s25  ;;  %p2173_p8 = scmp.eq.s32.totalorder %s1812_s13, 0 }
  0x7d   : > { %1693 = dma.done.wait (%p2173_p8), [#allocation10], 1024   ;;  %p2174_p9 = pmov %p2173_p8 }
  0x7e   : > { %p2175_p12 = pmov %p2173_p8 }
  0x7f   : > { %1695 = vsyncadd (%p2174_p9), [#allocation10], 4294966272 }
  0x80   : > { %1697 = dma.done.wait (%p2175_p12), [#allocation13], 1024   ;;  %p2176_p0 = pmov %p2173_p8 }
  0x81   : > { %s482_s5 = scalar_lea.sflag [#allocation16], %s1984_s24  ;;  %s485_s28 = scalar_lea.vmem [#allocation15], %s1987_s25 }
  0x82   : > { %1699 = vsyncadd (%p2176_p0), [#allocation13], 4294966272 }
  0x83   : > { %1701 = dma.done.wait (%p1821_p4), %s482_s5, 128  }
  0x84   : > { %1703 = vsyncadd (%p1821_p4), %s482_s5, 4294967168  ;;  %v546_v0 = vld [vmem:[#allocation9 + $0x10] sm:$0xff]  ;;  %v547_v1 = vld [vmem:[#allocation9 + $0x18] sm:$0xff]  ;;  %vm550_vm0 = vcmask 261120   ;;  %vm619_vm1 = vcmask 64512   ;;  %s1734_s15 = smov 112  }
  0x85   : > { %v571_v2 = vld [vmem:[#allocation11 + $0x10] sm:$0xff]  ;;  %v549_v3 = vpack.c.bf16 %v547_v1, %v546_v0  ;;  %v572_v4 = vld [vmem:[#allocation11 + $0x18] sm:$0xff]  ;;  %v544_v5 = vld [vmem:[#allocation9] sm:$0xff]  ;;  %s1735_s16 = smov 120   ;;  %s1736_s14 = smov 104   ;;  %vm669_vm2 = vcmask 1043456  }
  0x86   : > { %v545_v6 = vld [vmem:[#allocation9 + $0x8] sm:$0xff]  ;;  %v574_v7 = vpack.c.bf16 %v572_v4, %v571_v2  ;;  %v569_v8 = vld [vmem:[#allocation11] sm:$0xff]  ;;  %v542_v11 = vld [vmem:[%s435_s27] sm:$0xff]  ;;  %s1216_s21 = sshll.u32 %s1984_s24, 5  ;;  %s1737_s6 = smov 8  }
  0x87   : > { %v570_v9 = vld [vmem:[#allocation11 + $0x8] sm:$0xff]  ;;  %560 = vmatpush.bf16.msra.mxu0 %v549_v3  ;;  %v548_v10 = vpack.c.bf16 %v545_v6, %v544_v5  ;;  %v543_v14 = vpack.c.bf16 %v542_v11, %v542_v11  ;;  %v595_v38 = vld [vmem:[#allocation12 + $0x10] sm:$0xff]  ;;  %v596_v39 = vld [vmem:[#allocation12 + $0x18] sm:$0xff]  ;;  %s2054_s11 = scalar_lea.vmem [#allocation18], %s1216_s21  ;;  %s1738_s1 = smov 24  }
  0x88   : > { %584 = vmatpush.bf16.msra.mxu1 %v574_v7  ;;  %v573_v12 = vpack.c.bf16 %v570_v9, %v569_v8  ;;  %v567_v13 = vld [vmem:[%s445_s12] sm:$0xff]  ;;  %v598_v40 = vpack.c.bf16 %v596_v39, %v595_v38  ;;  %v591_v44 = vld [vmem:[%s455_s3] sm:$0xff]  ;;  %s1739_s18 = smov 16   ;;  %s1239_s22 = sshll.u32 %s1812_s13, 5 }
  0x89   : > { %v568_v15 = vpack.c.bf16 %v567_v13, %v567_v13  ;;  %v616_v33 = vld [vmem:[%s485_s28] sm:$0xff]  ;;  %v592_v45 = vpack.c.bf16 %v591_v44, %v591_v44  ;;  %s977_s26 = scalar_lea.hbm %s2139_s9, %s1239_s22  ;;  %s978_s4 = sshll.u32 %s2054_s11, 4  ;;  %s979_s4 = int_to_ptr.vmem [resolvable:$true] %s978_s4 }
  0x8a   : > { %608 = vmatpush.bf16.msra.mxu2 %v598_v40  ;;  %v593_v41 = vld [vmem:[#allocation12] sm:$0xff]  ;;  %v594_v42 = vld [vmem:[#allocation12 + $0x8] sm:$0xff]  ;;  %s980_s27 = sshll.u32 %s977_s26, 4  ;;  %s952_s20 = scalar_lea.sflag [#allocation19], %s1984_s24  ;;  %s981_s27 = int_to_ptr.hbm [resolvable:$true] %s980_s27 }
  0x8b   : > { %561 = vmatpush.bf16.msra.mxu0 %v548_v10  ;;  %v597_v43 = vpack.c.bf16 %v594_v42, %v593_v41  ;;  %s1626_s29 = sshra.s32 %s981_s27, 4  ;;  %s1632_s28 = scalar_lea.hbm %s2139_s9, 64  ;;  %s1627_s29 = int_to_ptr.hbm [resolvable:$true] %s1626_s29 }
  0x8c   : > { %585 = vmatpush.bf16.msra.mxu1 %v573_v12  ;;  %s1628_s12 = scalar_lea.hbm %s1627_s29, 32  ;;  %p1633_p1 = scmp.lt.s32.totalorder %s1627_s29, %s2139_s9 }
  0x8d   : > { %p1629_p4 = scmp.ne.s32.totalorder %s1627_s29, %s1628_s12  ;;  %p1634_p11 = scmp.lt.s32.totalorder %s1632_s28, %s1628_s12 }
  0x8e   : > { %1217 = vmatmul.msk.bf16.vlgmr.msra.gmra.mxu0 %vm550_vm0, %v543_v14  ;;  %609 = vmatpush.bf16.msra.mxu2 %v597_v43 }
  0x8f   : > { %1218 = vmatmul.msk.bf16.vlgmr.msra.gmra.mxu1 %vm550_vm0, %v568_v15  ;;  %p1630_p5 = pnand %p1629_p4, %p1871_p3  ;;  %p1635_p2 = por %p1634_p11, %p1633_p1 }
  0x91   : > { %1219 = vmatmul.msk.bf16.vlgmr.msra.gmra.mxu2 %vm550_vm0, %v592_v45  ;;  %p1631_p7 = pneg %p1630_p5 }
  0x93   : > { %p1636_p10 = pnand %p1635_p2, %p1631_p7 }
 0x10b   : > { %v563_v16 = vpop.f32.mrf.mxu0 }
 0x10c   : > { %v615_v17 = vmul.f32 0.35355338, %v563_v16  ;;  %v587_v18 = vpop.f32.mrf.mxu1 }
 0x10d   : > { %v618_v19 = vpack.c.bf16 %v587_v18, %v587_v18 }
 0x10e   : > { %v617_v20 = vpack.c.bf16 %v615_v17, %v615_v17 }
 0x10f   : > { %769 = vrot.lane.b32.xlu1 %v618_v19, %s1734_s15  ;;  %691 = vrot.lane.b32.xlu0 %v618_v19, %s1735_s16  ;;  %v624_v21 = vsel %vm619_vm1, %v618_v19, 0 }
 0x110   : > { %633 = vmatpush.bf16.xpose.msra.mxu3 %v624_v21  ;;  %767 = vrot.lane.b32.xlu2 %v617_v20, %s1734_s15 }
 0x113   : > { %v565_v22 = vpop.f32.mrf.mxu0 }
 0x114   : > { %v589_v23 = vpop.f32.mrf.mxu1  ;;  %v611_v0 = vpop.f32.mrf.mxu2 }
 0x115   : > { %v665_v3 = vpack.c.bf16 %v611_v0, %v611_v0 }
 0x117   : > { %846 = vrot.lane.b32.xlu1 %v618_v19, %s1736_s14  ;;  %688 = vrot.lane.b32.xlu0 %v617_v20, %s1735_s16  ;;  %v671_v4 = vsel %vm669_vm2, %v665_v3, 0 }
 0x118   : > { %1220 = vmatmul.msk.bf16.vlgmr.msra.gmra.mxu3 %vm619_vm1, %v617_v20  ;;  %844 = vrot.lane.b32.xlu2 %v617_v20, %s1736_s14 }
 0x119   : > { %680 = vmatpush.bf16.msrb.mxu0 %v671_v4 }
 0x11c   : > { %v613_v5 = vpop.f32.mrf.mxu2 }
 0x16a   : > { %v768_v28 = vpop.permute.xlu2 %767 }
 0x172   : > { %v845_v32 = vpop.permute.xlu2 %844 }
 0x181   : > { %v770_v24 = vpop.permute.xlu1 %769  ;;  %v692_v25 = vpop.permute.xlu0 %691 }
 0x182   : > { %v697_v26 = vsel %vm619_vm1, %v692_v25, 0  ;;  %v775_v27 = vsel %vm619_vm1, %v770_v24, 0 }
 0x183   : > { %706 = vmatpush.bf16.xpose.msrb.mxu1 %v697_v26  ;;  %784 = vmatpush.bf16.xpose.msrb.mxu3 %v775_v27 }
 0x189   : > { %v847_v29 = vpop.permute.xlu1 %846  ;;  %v689_v30 = vpop.permute.xlu0 %688 }
 0x18a   : > { %v852_v31 = vsel %vm619_vm1, %v847_v29, 0  ;;  %1222 = vmatmul.msk.bf16.vlgmr.msrb.gmra.mxu1 %vm619_vm1, %v689_v30  ;;  %1225 = vmatmul.msk.bf16.vlgmr.msrb.gmra.mxu3 %vm619_vm1, %v768_v28 }
 0x18b   : > { %861 = vmatpush.bf16.xpose.msra.mxu1 %v852_v31 }
 0x19a   : > { %1228 = vmatmul.msk.bf16.vlgmr.msra.gmra.mxu1 %vm619_vm1, %v845_v32 }
 0x19b   : > { %v635_v34 = vpop.f32.mrf.mxu3 }
 0x19c   : > { %v636_v35 = vadd.f32 %v635_v34, %v616_v33 }
 0x19e   : > { %v639_v36 = vsel %vm619_vm1, %v636_v35, -inf }
 0x19f   : > { %640 = vmax.xlane.f32.xlu1 %v639_v36 }
 0x1a3   : > { %v637_v37 = vpop.f32.mrf.mxu3 }
 0x207   : > { %v708_v46 = vpop.f32.mrf.mxu1 }
 0x208   : > { %v709_v47 = vadd.f32 %v708_v46, %v616_v33 }
 0x20a   : > { %v712_v48 = vsel %vm619_vm1, %v709_v47, -inf }
 0x20b   : > { %713 = vmax.xlane.f32.xlu0 %v712_v48 }
 0x20d   : > { %v786_v49 = vpop.f32.mrf.mxu3 }
 0x20e   : > { %v787_v59 = vadd.f32 %v786_v49, %v616_v33 }
 0x20f   : > { %v710_v50 = vpop.f32.mrf.mxu1 }
 0x210   : > { %v790_v62 = vsel %vm619_vm1, %v787_v59, -inf }
 0x212   : > { %v641_v51 = vpop.xlane.xlu1 %640 }
 0x213   : > { %v642_v52 = vsub.f32 %v636_v35, %v641_v51 }
 0x215   : > { %v643_v53 = vmul.f32 1.442695, %v642_v52  ;;  %v788_v54 = vpop.f32.mrf.mxu3 }
 0x217   : > { %1356 = vpow2.f32 %v643_v53  ;;  %v863_v55 = vpop.f32.mrf.mxu1 }
 0x218   : > { %v864_v56 = vadd.f32 %v863_v55, %v616_v33 }
 0x21a   : > { %v867_v57 = vsel %vm619_vm1, %v864_v56, -inf }
 0x21b   : > { %868 = vmax.xlane.f32.xlu2 %v867_v57 }
 0x21d   : > { %v1357_v58 = vpop.eup %1356 }
 0x21e   : > { %v645_v60 = vsel %vm619_vm1, %v1357_v58, 0.0 }
 0x21f   : > { %646 = vadd.xlane.f32.xlu1 %v645_v60  ;;  %v865_v61 = vpop.f32.mrf.mxu1 }
 0x223   : > { %791 = vmax.xlane.f32.xlu2 %v790_v62 }
 0x27e   : > { %v714_v63 = vpop.xlane.xlu0 %713 }
 0x27f   : > { %v715_v1 = vsub.f32 %v709_v47, %v714_v63 }
 0x281   : > { %v716_v2 = vmul.f32 1.442695, %v715_v1 }
 0x283   : > { %1358 = vpow2.f32 %v716_v2 }
 0x289   : > { %v1359_v6 = vpop.eup %1358 }
 0x28a   : > { %v718_v7 = vsel %vm619_vm1, %v1359_v6, 0.0 }
 0x28b   : > { %719 = vadd.xlane.f32.xlu0 %v718_v7 }
 0x28e   : > { %v869_v8 = vpop.xlane.xlu2 %868 }
 0x28f   : > { %v870_v9 = vsub.f32 %v864_v56, %v869_v8 }
 0x291   : > { %v871_v10 = vmul.f32 1.442695, %v870_v9 }
 0x292   : > { %v647_v11 = vpop.xlane.xlu1 %646 }
 0x293   : > { %1360 = vpow2.f32 %v871_v10  ;;  %v659_v20 = vand.u32 2147483648, %v647_v11  ;;  %v657_v22 = vand.u32 2147483647, %v647_v11  ;;  %vm653_vm4 = vweird.f32 %v647_v11 }
 0x294   : > { %1362 = vrcp.f32 %v647_v11 }
 0x295   : > { %v660_v25 = vor.u32 1.1754944e-38, %v659_v20  ;;  %vm658_vm6 = vcmp.eq.f32.partialorder %v657_v22, 8.507059e+37  ;;  %v925_v20 = vld [vmem:[#allocation14 + $0x10] sm:$0xff]  ;;  %v923_v22 = vld [vmem:[#allocation14] sm:$0xff] }
 0x296   : > { %v792_v12 = vpop.xlane.xlu2 %791 }
 0x297   : > { %v793_v13 = vsub.f32 %v787_v59, %v792_v12 }
 0x299   : > { %v2044_v14 = vpop.eup %1360  ;;  %v794_v15 = vmul.f32 1.442695, %v793_v13 }
 0x29a   : > { %v1363_v16 = vpop.eup %1362  ;;  %v873_v17 = vsel %vm619_vm1, %v2044_v14, 0.0 }
 0x29b   : > { %v649_v18 = vmul.f32 %v1363_v16, %v647_v11  ;;  %1364 = vpow2.f32 %v794_v15  ;;  %874 = vadd.xlane.f32.xlu2 %v873_v17  ;;  %vm654_vm3 = vweird.f32 %v1363_v16 }
 0x29c   : > { %vm655_vm5 = vmor %vm653_vm4, %vm654_vm3 }
 0x29d   : > { %v650_v19 = vsub.f32 1.0, %v649_v18 }
 0x29f   : > { %v651_v21 = vmul.f32 %v1363_v16, %v650_v19  ;;  %740 = vrot.lane.b32.xlu0 %v665_v3, %s1735_s16 }
 0x2a1   : > { %v2049_v23 = vpop.eup %1364  ;;  %v652_v24 = vadd.f32 %v1363_v16, %v651_v21  ;;  %v926_v21 = vld [vmem:[#allocation14 + $0x18] sm:$0xff] }
 0x2a2   : > { %v796_v26 = vsel %vm619_vm1, %v2049_v23, 0.0 }
 0x2a3   : > { %v656_v27 = vsel %vm655_vm5, %v1363_v16, %v652_v24  ;;  %797 = vadd.xlane.f32.xlu1 %v796_v26  ;;  %v924_v24 = vld [vmem:[#allocation14 + $0x8] sm:$0xff] }
 0x2a4   : > { %v661_v28 = vsel %vm658_vm6, %v660_v25, %v656_v27  ;;  %v927_v25 = vpack.c.bf16 %v924_v24, %v923_v22  ;;  %vm919_vm6 = vcmask 261312  }
 0x2a5   : > { %v662_v29 = vmul.f32 %v1357_v58, %v661_v28 }
 0x2a7   : > { %663 = vst.msk [vmem:[%s2054_s11] sm:$0xff] %vm619_vm1, %v662_v29  ;;  %v664_v30 = vpack.c.bf16 %v662_v29, %v662_v29 }
 0x2a9   : > { %1221 = vmatmul.msk.bf16.vlgmr.msrb.gmra.mxu0 %vm619_vm1, %v664_v30 }
 0x2b3   : > { %894 = vrot.lane.b32.xlu2 %v665_v3, %s1736_s14 }
 0x2bc   : > { %817 = vrot.lane.b32.xlu1 %v665_v3, %s1734_s15 }
 0x2fe   : > { %v720_v31 = vpop.xlane.xlu0 %719 }
 0x2ff   : > { %1366 = vrcp.f32 %v720_v31  ;;  %v732_v36 = vand.u32 2147483648, %v720_v31  ;;  %v730_v37 = vand.u32 2147483647, %v720_v31  ;;  %vm726_vm8 = vweird.f32 %v720_v31 }
 0x301   : > { %v733_v40 = vor.u32 1.1754944e-38, %v732_v36  ;;  %vm731_vm10 = vcmp.eq.f32.partialorder %v730_v37, 8.507059e+37 }
 0x305   : > { %v1367_v32 = vpop.eup %1366 }
 0x306   : > { %v722_v33 = vmul.f32 %v1367_v32, %v720_v31  ;;  %vm727_vm7 = vweird.f32 %v1367_v32 }
 0x307   : > { %vm728_vm9 = vmor %vm726_vm8, %vm727_vm7 }
 0x308   : > { %v723_v34 = vsub.f32 1.0, %v722_v33 }
 0x30a   : > { %v724_v35 = vmul.f32 %v1367_v32, %v723_v34 }
 0x30c   : > { %v725_v38 = vadd.f32 %v1367_v32, %v724_v35 }
 0x30e   : > { %v729_v39 = vsel %vm728_vm9, %v1367_v32, %v725_v38  ;;  %v875_v41 = vpop.xlane.xlu2 %874 }
 0x30f   : > { %1368 = vrcp.f32 %v875_v41  ;;  %v734_v42 = vsel %vm731_vm10, %v733_v40, %v729_v39  ;;  %v887_v53 = vand.u32 2147483648, %v875_v41  ;;  %v885_v55 = vand.u32 2147483647, %v875_v41 }
 0x310   : > { %v735_v44 = vmul.f32 %v1359_v6, %v734_v42  ;;  %vm881_vm12 = vweird.f32 %v875_v41 }
 0x311   : > { %v741_v43 = vpop.permute.xlu0 %740  ;;  %v888_v58 = vor.u32 1.1754944e-38, %v887_v53  ;;  %vm886_vm14 = vcmp.eq.f32.partialorder %v885_v55, 8.507059e+37 }
 0x312   : > { %v746_v45 = vsel %vm669_vm2, %v741_v43, 0  ;;  %1223 = vst.msk [vmem:[%s2054_s11 + $0x8] sm:$0xff] %vm619_vm1, %v735_v44  ;;  %v738_v46 = vpack.c.bf16 %v735_v44, %v735_v44 }
 0x313   : > { %755 = vmatpush.bf16.msrb.mxu2 %v746_v45 }
 0x315   : > { %v1369_v47 = vpop.eup %1368 }
 0x316   : > { %v877_v48 = vmul.f32 %v1369_v47, %v875_v41  ;;  %1224 = vmatmul.msk.bf16.vlgmr.msrb.gmra.mxu2 %vm619_vm1, %v738_v46  ;;  %v895_v49 = vpop.permute.xlu2 %894  ;;  %v798_v50 = vpop.xlane.xlu1 %797  ;;  %vm882_vm11 = vweird.f32 %v1369_v47 }
 0x317   : > { %v900_v51 = vsel %vm669_vm2, %v895_v49, 0  ;;  %1370 = vrcp.f32 %v798_v50  ;;  %vm883_vm13 = vmor %vm881_vm12, %vm882_vm11  ;;  %v810_v0 = vand.u32 2147483648, %v798_v50  ;;  %v808_v2 = vand.u32 2147483647, %v798_v50 }
 0x318   : > { %v878_v52 = vsub.f32 1.0, %v877_v48  ;;  %909 = vmatpush.bf16.msra.mxu2 %v900_v51  ;;  %vm804_vm3 = vweird.f32 %v798_v50 }
 0x319   : > { %v811_v5 = vor.u32 1.1754944e-38, %v810_v0  ;;  %vm809_vm5 = vcmp.eq.f32.partialorder %v808_v2, 8.507059e+37 }
 0x31a   : > { %v879_v54 = vmul.f32 %v1369_v47, %v878_v52 }
 0x31c   : > { %v880_v56 = vadd.f32 %v1369_v47, %v879_v54 }
 0x31d   : > { %v1371_v57 = vpop.eup %1370 }
 0x31e   : > { %v884_v59 = vsel %vm883_vm13, %v1369_v47, %v880_v56  ;;  %v800_v60 = vmul.f32 %v1371_v57, %v798_v50  ;;  %vm805_vm15 = vweird.f32 %v1371_v57 }
 0x31f   : > { %v889_v61 = vsel %vm886_vm14, %v888_v58, %v884_v59  ;;  %vm806_vm4 = vmor %vm804_vm3, %vm805_vm15 }
 0x320   : > { %v890_v62 = vmul.f32 %v2044_v14, %v889_v61  ;;  %v801_v63 = vsub.f32 1.0, %v800_v60 }
 0x322   : > { %1229 = vst.msk [vmem:[%s2054_s11 + $0x18] sm:$0xff] %vm619_vm1, %v890_v62  ;;  %v802_v1 = vmul.f32 %v1371_v57, %v801_v63  ;;  %v893_v4 = vpack.c.bf16 %v890_v62, %v890_v62 }
 0x324   : > { %v803_v3 = vadd.f32 %v1371_v57, %v802_v1 }
 0x326   : > { %v807_v6 = vsel %vm806_vm4, %v1371_v57, %v803_v3  ;;  %v682_v7 = vpop.f32.mrf.mxu0  ;;  %1230 = vmatmul.msk.bf16.vlgmr.msra.gmra.mxu2 %vm619_vm1, %v893_v4 }
 0x327   : > { %v812_v8 = vsel %vm809_vm5, %v811_v5, %v807_v6  ;;  %686 = vst.msk [vmem:[#allocation2] sm:$0xff] %vm619_vm1, %v682_v7 }
 0x328   : > { %v813_v9 = vmul.f32 %v2049_v23, %v812_v8  ;;  %v928_v23 = vpack.c.bf16 %v926_v21, %v925_v20 }
 0x32a   : > { %1226 = vst.msk [vmem:[%s2054_s11 + $0x10] sm:$0xff] %vm619_vm1, %v813_v9  ;;  %v816_v13 = vpack.c.bf16 %v813_v9, %v813_v9  ;;  %938 = vmatpush.bf16.msra.mxu3 %v928_v23 }
 0x32e   : > { %v684_v10 = vpop.f32.mrf.mxu0  ;;  %v818_v11 = vpop.permute.xlu1 %817  ;;  %939 = vmatpush.bf16.msra.mxu3 %v927_v25 }
 0x32f   : > { %v823_v12 = vsel %vm669_vm2, %v818_v11, 0  ;;  %vm842_vm2 = vcmask 195712  }
 0x330   : > { %832 = vmatpush.bf16.msra.mxu0 %v823_v12 }
 0x333   : > { %1227 = vmatmul.msk.bf16.vlgmr.msra.gmra.mxu0 %vm619_vm1, %v816_v13  ;;  %vm765_vm1 = vcmask 130112  }
 0x399   : > { %v757_v14 = vpop.f32.mrf.mxu2 }
 0x39a   : > { %762 = vrot.lane.b32.xlu0 %v757_v14, %s1737_s6 }
 0x3a1   : > { %v759_v15 = vpop.f32.mrf.mxu2 }
 0x3a9   : > { %v911_v16 = vpop.f32.mrf.mxu2 }
 0x3aa   : > { %916 = vrot.lane.b32.xlu2 %v911_v16, %s1738_s1 }
 0x3b0   : > { %v834_v17 = vpop.f32.mrf.mxu0 }
 0x3b1   : > { %v913_v18 = vpop.f32.mrf.mxu2  ;;  %839 = vrot.lane.b32.xlu0 %v834_v17, %s1739_s18 }
 0x3b8   : > { %v836_v19 = vpop.f32.mrf.mxu0 }
 0x404   : > { %v917_v28 = vpop.permute.xlu2 %916 }
 0x40c   : > { %v763_v26 = vpop.permute.xlu0 %762 }
 0x40d   : > { %766 = vst.msk [vmem:[#allocation2] sm:$0xff] %vm765_vm1, %v763_v26 }
 0x423   : > { %v840_v27 = vpop.permute.xlu0 %839 }
 0x424   : > { %843 = vst.msk [vmem:[#allocation2] sm:$0xff] %vm842_vm2, %v840_v27 }
 0x425   : > { %920 = vst.msk [vmem:[#allocation2] sm:$0xff] %vm919_vm6, %v917_v28 }
 0x42c   : > { %v921_v29 = vld [vmem:[#allocation2] sm:$0xff] }
 0x42d   : > { %v922_v30 = vpack.c.bf16 %v921_v29, %v921_v29 }
 0x42f   : > { %1231 = vmatmul.msk.bf16.vlgmr.msra.gmra.mxu3 %vm550_vm0, %v922_v30 }
 0x430   : > { %1639 = shalt.err (!%p1636_p10)
}
 0x431   : > { %s1740_s14 = smov 128   ;;  %s1234_s21 = sshll.u32 %s1812_s13, 3 }
 0x432   : > { %1265 = dma.vmem_to_hbm [thread:$0]  (%p1871_p3), %s979_s4, 512, %s981_s27, %s952_s20, %s1740_s14, %s1740_s14, %s1737_s6  }
 0x433   : > { %s962_s18 = scalar_lea.hbm %s2138_s8, %s1234_s21  ;;  %s533_s22 = scalar_lea.vmem [#allocation17], %s1987_s25 }
 0x434   : > { %s964_s17 = sshll.u32 %s533_s22, 4  ;;  %s966_s23 = sshll.u32 %s962_s18, 4  ;;  %s965_s17 = int_to_ptr.vmem [resolvable:$true] %s964_s17  ;;  %s967_s23 = int_to_ptr.hbm [resolvable:$true] %s966_s23 }
 0x435   : > { %s947_s26 = scalar_lea.sflag [#allocation5], %s1984_s24  ;;  %s1654_s29 = sshra.s32 %s967_s23, 4  ;;  %s1655_s29 = int_to_ptr.hbm [resolvable:$true] %s1654_s29 }
 0x436   : > { %s1656_s12 = scalar_lea.hbm %s1655_s29, 8  ;;  %s1660_s4 = scalar_lea.hbm %s2138_s8, 16 }
 0x437   : > { %p1657_p13 = scmp.ne.s32.totalorder %s1655_s29, %s1656_s12  ;;  %p1661_p12 = scmp.lt.s32.totalorder %s1655_s29, %s2138_s8 }
 0x438   : > { %p1662_p0 = scmp.lt.s32.totalorder %s1660_s4, %s1656_s12 }
 0x439   : > { %p1658_p8 = pnand %p1657_p13, %p1871_p3 }
 0x43a   : > { %p1663_p4 = por %p1662_p0, %p1661_p12 }
 0x43b   : > { %p1659_p9 = pneg %p1658_p8 }
 0x43d   : > { %p1664_p5 = pnand %p1663_p4, %p1659_p9 }
 0x4b2   : > { %v941_v31 = vpop.f32.mrf.mxu3 }
 0x4b3   : > { %945 = vst.msk [vmem:[%s533_s22] sm:$0xff] %vm550_vm0, %v941_v31 }
 0x4b4   : > { %1667 = shalt.err (!%p1664_p5)
}
 0x4b5   : > { %1264 = dma.vmem_to_hbm [thread:$0]  (%p1871_p3), %s965_s17, 128, %s967_s23, %s947_s26  }
 0x4ba   : > { %v943_v32 = vpop.f32.mrf.mxu3 }
 0x4bb PF: > { %s2178_s20 = sld [smem:[#allocation28_spill]]  ;;  %s995_s3 = sand.u32 1, %s1714_s30  }
 0x4bc   : > { %s996_s5 = scalar_lea.sflag [#allocation5], %s995_s3 }
 0x4c1   : > { %p2179_p7 = scmp.ge.s32.totalorder %s2178_s20, 2 }
 0x4c3   : > { %p1295_p1 = pnand %p2179_p7, %p1826_p6 }
 0x4c5   : > { %p1296_p11 = pneg %p1295_p1 }
 0x4c7   : > { %1705 = dma.done.wait (%p1296_p11), %s996_s5, 128  }
 0x4c8   : > { %1707 = vsyncadd (%p1296_p11), %s996_s5, 4294967168  ;;  %s1006_s28 = scalar_lea.sflag [#allocation19], %s995_s3 }
 0x4c9   : > { %1709 = dma.done.wait (%p1296_p11), %s1006_s28, 512  }
 0x4ca   : > { %1711 = vsyncadd (%p1296_p11), %s1006_s28, 4294966784  ;;  %s2180_s12 = sld [smem:[#allocation30_spill]]  ;;  %s2183_s30 = smov %s1718_s10 }
 0x4cb   : > { %s2181_s19 = sld [smem:[#allocation27_spill]] }
 0x4cc   : > { %s2182_s11 = sld [smem:[#allocation31_spill]] }
 0x4d0   : > { %p34_p3 = scmp.ge.s32.totalorder %s2180_s12, 4  }
 0x4d1   : > { %s2184_s10 = smov %s2181_s19 }
 0x4d2   :  { %36 = sbr.rel (!%p34_p3) target bundleno = 19 (0x13), region = 170 }
 0x4d7   :  { %1012 = vsyncpa [#allocation4], 1 }
 0x4d8   :  { %1014 = vsyncpa [#allocation4 + $0x1], 1 }
 0x4d9   :  { %1015 = vsyncpa [#allocation7], 1 }
 0x4da   :  { %1017 = vsyncpa [#allocation7 + $0x1], 1 }
 0x4db   :  { %1018 = vsyncpa [#allocation10], 1 }
 0x4dc   :  { %1019 = vsyncpa [#allocation13], 1 }
 0x4dd   :  { %1020 = vsyncpa [#allocation16], 1 }
 0x4de   :  { %1022 = vsyncpa [#allocation16 + $0x1], 1 }
 0x4df   :  { %1023 = vsyncpa [#allocation5], 1 }
 0x4e0   :  { %1025 = vsyncpa [#allocation5 + $0x1], 1 }
 0x4e1   :  { %1026 = vsyncpa [#allocation19], 1 }
 0x4e2   :  { %1028 = vsyncpa [#allocation19 + $0x1], 1 }

</bundles_post_ra>
